<compile_context>
chip_gen: v7x
topology: tpu7x:2x2x1
jax: 0.10.0
libtpu: 0.0.40
codegen_flags: <defaults>
</compile_context>

<pallas_src>
import jax
import jax.numpy as jnp
import numpy as np
from jax import lax
from jax.experimental import pallas as pl
from jax.experimental.pallas import tpu as pltpu


# ----------------------------------------------------------------------------- kernel
def criterion_kernel(preds_ref, glue_ref, out_ref):
    # preds_ref: (2B, L) f32/bf16 -- rows [0:B]  = pred_logits.reshape(B, N*2) (lane 2n+c = class-c logit)
    #                                 rows [B:2B] = pred_points.reshape(B, N*2) (lane 2n+c = coord c)
    # glue_ref:  (4B, L) f32 host-packed matcher glue with normalizers pre-folded:
    #              rows [0:B]   wq   : w_n / sum(w)            at BOTH lanes 2n, 2n+1
    #              rows [B:2B]  wsel : w_n / sum(w)            at the target-class lane 2n + t_n
    #              rows [2B:3B] mskd : 1 / clamp(num_points,1) at both lanes of matched queries
    #              rows [3B:4B] tp   : matched target points scattered to query slots (x,y interleaved)
    # out_ref:   (1, 128) f32 -- lane 0 = loss_ce, lane 1 = loss_points
    B = glue_ref.shape[0] // 4
    x = preds_ref[0:B, :].astype(jnp.float32)          # (B, L) logits (upcast: v5e has no bf16 VPU)
    pp = preds_ref[B:2 * B, :].astype(jnp.float32)      # (B, L) points
    wq = glue_ref[0:B, :]
    wsel = glue_ref[B:2 * B, :]
    mskd = glue_ref[2 * B:3 * B, :]
    tp = glue_ref[3 * B:4 * B, :]

    L = x.shape[1]

    # Partner logit of every lane via a single XLU roll.  The validity mask (exactly one lane per
    # class pair sees its true partner) is derived from a rolled iota, so the math is correct for
    # either hardware roll direction; wrap lanes land on an invalid lane automatically.
    x_r = pltpu.roll(x, shift=1, axis=1)
    lane = lax.broadcasted_iota(jnp.int32, (B, L), 1)
    partner_f = (lane ^ 1).astype(jnp.float32)
    lane_r = pltpu.roll(lane.astype(jnp.float32), shift=1, axis=1)
    valid = lane_r == partner_f                          # exactly one valid lane per query

    # Closed-form binary logsumexp of the pair (symmetric in the two operands).
    hi = jnp.maximum(x, x_r)
    lse = hi + jnp.log(1.0 + jnp.exp(-jnp.abs(x - x_r)))

    wv = jnp.where(valid, wq, 0.0)                       # per-query CE weight, counted exactly once

    # Normalizers are folded into the glue -> the losses are plain sums (no divides, no SMEM scalar).
    loss_ce = jnp.sum(wv * lse - wsel * x)               # = sum_n w_n*(lse_n - logit_{t_n}) / sum(w)
    loss_pts = jnp.sum(mskd * (pp - tp) ** 2)            # = matched-pair SSE / clamp(num_points, 1)

    out_lane = lax.broadcasted_iota(jnp.int32, out_ref.shape, 1)
    out_ref[...] = jnp.where(out_lane == 0, loss_ce, loss_pts)


# ----------------------------------------------------------------------------- wrapper
def set_criterion_crowd(pred_logits, pred_points, glue):
    """pred_logits (B, N, 2), pred_points (B, N, 2) in PyTorch layout — only free reshapes plus one
       tiny concat here (no transposes).  glue: (4B, 2N) host-packed slab (see build_glue).
       Returns (loss_ce, loss_points)."""
    B, N, C = pred_logits.shape
    assert C == 2, "kernel specializes APGCC's binary (person / no-object) classification"
    L = N * C
    # One prediction operand for the pallas_call (2 input DMAs total instead of 4-5).
    preds = jnp.concatenate([pred_logits.reshape(B, L), pred_points.reshape(B, L)], axis=0)

    vmem = pl.BlockSpec(memory_space=pltpu.MemorySpace.VMEM)

    bytes_accessed = (preds.size * preds.dtype.itemsize
                      + glue.size * glue.dtype.itemsize
                      + 128 * 4)
    cost = pl.CostEstimate(flops=int(14 * B * L),
                           transcendentals=int(2 * B * L),
                           bytes_accessed=int(bytes_accessed))

    out = pl.pallas_call(
        criterion_kernel,
        out_shape=jax.ShapeDtypeStruct((1, 128), jnp.float32),
        in_specs=[vmem, vmem],
        out_specs=vmem,
        cost_estimate=cost,
    )(preds, glue)
    return out[0, 0], out[0, 1]


def build_glue(target_classes, match_mask, tgt_points_scat, eos_coef, num_points):
    """Host-side (numpy) packing of the matcher-derived targets into ONE sublane-dense (4B, 2N)
       slab.  All normalizers (1/sum(w), 1/clamp(num_points,1)) are folded in, so the kernel is
       divide-free and num_points never becomes a trace-time constant."""
    tc = np.asarray(target_classes, dtype=np.int64)
    B, N = tc.shape
    L = 2 * N
    w = np.where(tc == 0, np.float32(eos_coef), np.float32(1.0)).astype(np.float32)   # (B, N)
    w_n = w / np.float32(w.sum())                                                     # fold 1/sum(w)
    wq = np.repeat(w_n, 2, axis=1)                                                    # (B, L)
    onehot = np.eye(2, dtype=np.float32)[np.clip(tc, 0, 1)]                           # (B, N, 2)
    wsel = (w_n[..., None] * onehot).reshape(B, L)                                    # (B, L)
    inv_np = np.float32(1.0) / np.float32(max(float(num_points), 1.0))                # clamp(min=1)
    mskd = np.repeat(np.asarray(match_mask, dtype=np.float32) * inv_np, 2, axis=1)    # (B, L)
    tp = np.asarray(tgt_points_scat, dtype=np.float32).reshape(B, L)                  # (B, L)
    return jnp.asarray(np.concatenate([wq, wsel, mskd, tp], axis=0))                  # (4B, L)


# ----------------------------------------------------------------------------- reference
def ref_losses(pred_logits, pred_points, target_classes, match_mask,
               tgt_points_scat, eos_coef, num_points):
    logp = jax.nn.log_softmax(pred_logits.astype(jnp.float32), axis=-1)      # (B, N, C)
    nll = -jnp.take_along_axis(logp, target_classes[..., None], axis=-1)[..., 0]
    w = jnp.where(target_classes == 0, eos_coef, 1.0)
    loss_ce = jnp.sum(w * nll) / jnp.sum(w)
    npts = max(float(num_points), 1.0)
    loss_pts = jnp.sum(((pred_points - tgt_points_scat) ** 2) * match_mask[..., None]) / npts
    return loss_ce, loss_pts


# ----------------------------------------------------------------------------- driver
if __name__ == "__main__":
    B, N = 2, 128                 # batch, number of point proposals (queries)
    num_classes = 1               # crowd counting: person vs. no-object
    C = num_classes + 1
    eos_coef = 0.5

    key = jax.random.PRNGKey(0)
    k1, k2, k3 = jax.random.split(key, 3)
    pred_logits = jax.random.normal(k1, (B, N, C), dtype=jnp.float32)
    pred_points = 64.0 * jax.random.uniform(k2, (B, N, 2), dtype=jnp.float32)

    # synthetic targets: n_gt ground-truth points per image, all labeled class 1
    n_gt = [5, 9]
    gt_points = [64.0 * jax.random.uniform(jax.random.fold_in(k3, b), (n_gt[b], 2),
                                           dtype=jnp.float32) for b in range(B)]
    gt_labels = [np.ones((n_gt[b],), dtype=np.int32) for b in range(B)]

    # TODO(synk): the Hungarian matcher, the optional auxiliary losses ('loss_aux' branch) and the
    # distributed all_reduce of num_points are external modules with no clean Pallas equivalent;
    # deterministic match indices are supplied here instead.
    indices = [(np.array([(7 * j) % N for j in range(n_gt[b])], dtype=np.int32),
                np.arange(n_gt[b], dtype=np.int32)) for b in range(B)]

    # dense targets from matcher indices (host glue, matches torch scatter semantics)
    target_classes = np.zeros((B, N), dtype=np.int32)
    match_mask = np.zeros((B, N), dtype=np.float32)
    tgt_points_scat = np.zeros((B, N, 2), dtype=np.float32)
    for b, (src, tgt) in enumerate(indices):
        target_classes[b, src] = gt_labels[b][tgt]
        match_mask[b, src] = 1.0
        tgt_points_scat[b, src] = np.asarray(gt_points[b])[tgt]

    num_points = float(max(sum(n_gt), 1))   # clamp(num_points / world_size, min=1)

    glue = build_glue(target_classes, match_mask, tgt_points_scat, eos_coef, num_points)

    loss_ce, loss_pts = set_criterion_crowd(pred_logits, pred_points, glue)
    jax.block_until_ready((loss_ce, loss_pts))

    ref_ce, ref_pts = ref_losses(pred_logits, pred_points, jnp.asarray(target_classes),
                                 jnp.asarray(match_mask), jnp.asarray(tgt_points_scat),
                                 eos_coef, num_points)

    np.testing.assert_allclose(np.asarray(loss_ce), np.asarray(ref_ce), rtol=1e-4, atol=1e-5)
    np.testing.assert_allclose(np.asarray(loss_pts), np.asarray(ref_pts), rtol=1e-4, atol=1e-5)
    print("KERNEL_OK")
</pallas_src>

<mosaic_0001>
module attributes {stable_mosaic.version = 11 : i64} {
  func.func @criterion_kernel(%arg0: memref<4x256xf32, #tpu.memory_space<vmem>>, %arg1: memref<8x256xf32, #tpu.memory_space<vmem>>, %arg2: memref<1x128xf32, #tpu.memory_space<vmem>>) attributes {dimension_semantics = [], scalar_prefetch = 0 : i64, scratch_operands = 0 : i64, tpu.core_type = #tpu.core_type<tc>} {
    %c0 = arith.constant 0 : index
    %c0_0 = arith.constant 0 : index
    %0 = vector.load %arg0[%c0, %c0_0] : memref<4x256xf32, #tpu.memory_space<vmem>>, vector<2x256xf32>
    %c2 = arith.constant 2 : index
    %c0_1 = arith.constant 0 : index
    %1 = vector.load %arg0[%c2, %c0_1] : memref<4x256xf32, #tpu.memory_space<vmem>>, vector<2x256xf32>
    %c0_2 = arith.constant 0 : index
    %c0_3 = arith.constant 0 : index
    %2 = vector.load %arg1[%c0_2, %c0_3] : memref<8x256xf32, #tpu.memory_space<vmem>>, vector<2x256xf32>
    %c2_4 = arith.constant 2 : index
    %c0_5 = arith.constant 0 : index
    %3 = vector.load %arg1[%c2_4, %c0_5] : memref<8x256xf32, #tpu.memory_space<vmem>>, vector<2x256xf32>
    %c4 = arith.constant 4 : index
    %c0_6 = arith.constant 0 : index
    %4 = vector.load %arg1[%c4, %c0_6] : memref<8x256xf32, #tpu.memory_space<vmem>>, vector<2x256xf32>
    %c6 = arith.constant 6 : index
    %c0_7 = arith.constant 0 : index
    %5 = vector.load %arg1[%c6, %c0_7] : memref<8x256xf32, #tpu.memory_space<vmem>>, vector<2x256xf32>
    %c1_i32 = arith.constant 1 : i32
    %6 = tpu.dynamic_rotate %0 by %c1_i32 dim 1 : vector<2x256xf32>, i32 -> vector<2x256xf32>
    %7 = tpu.iota {dimensions = array<i32: 1>} : vector<2x256xi32>
    %c1_i32_8 = arith.constant 1 : i32
    %8 = vector.broadcast %c1_i32_8 : i32 to vector<2x256xi32>
    %9 = arith.xori %7, %8 : vector<2x256xi32>
    %10 = arith.sitofp %9 : vector<2x256xi32> to vector<2x256xf32>
    %11 = arith.sitofp %7 : vector<2x256xi32> to vector<2x256xf32>
    %c1_i32_9 = arith.constant 1 : i32
    %12 = tpu.dynamic_rotate %11 by %c1_i32_9 dim 1 : vector<2x256xf32>, i32 -> vector<2x256xf32>
    %13 = arith.cmpf oeq, %12, %10 : vector<2x256xf32>
    %14 = arith.maximumf %0, %6 : vector<2x256xf32>
    %15 = arith.subf %0, %6 : vector<2x256xf32>
    %16 = math.absf %15 : vector<2x256xf32>
    %cst = arith.constant 0.000000e+00 : f32
    %17 = vector.broadcast %cst : f32 to vector<2x256xf32>
    %18 = arith.subf %17, %16 : vector<2x256xf32>
    %19 = math.exp %18 : vector<2x256xf32>
    %cst_10 = arith.constant 1.000000e+00 : f32
    %20 = vector.broadcast %cst_10 : f32 to vector<2x256xf32>
    %21 = arith.addf %20, %19 : vector<2x256xf32>
    %22 = math.log %21 : vector<2x256xf32>
    %23 = arith.addf %14, %22 : vector<2x256xf32>
    %cst_11 = arith.constant 0.000000e+00 : f32
    %24 = vector.broadcast %cst_11 : f32 to vector<2x256xf32>
    %25 = arith.select %13, %2, %24 : vector<2x256xi1>, vector<2x256xf32>
    %26 = arith.mulf %25, %23 : vector<2x256xf32>
    %27 = arith.mulf %3, %0 : vector<2x256xf32>
    %28 = arith.subf %26, %27 : vector<2x256xf32>
    %29 = vector.shape_cast %28 : vector<2x256xf32> to vector<1x2x256xf32>
    %cst_12 = arith.constant dense<0.000000e+00> : vector<1xf32>
    %30 = vector.multi_reduction <add>, %29, %cst_12 [1, 2] : vector<1x2x256xf32> to vector<1xf32>
    %31 = vector.shape_cast %30 : vector<1xf32> to vector<1x1x1xf32>
    %32 = vector.extract %31[0, 0, 0] : f32 from vector<1x1x1xf32>
    %33 = arith.subf %1, %5 : vector<2x256xf32>
    %34 = arith.mulf %33, %33 : vector<2x256xf32>
    %35 = arith.mulf %4, %34 : vector<2x256xf32>
    %36 = vector.shape_cast %35 : vector<2x256xf32> to vector<1x2x256xf32>
    %cst_13 = arith.constant dense<0.000000e+00> : vector<1xf32>
    %37 = vector.multi_reduction <add>, %36, %cst_13 [1, 2] : vector<1x2x256xf32> to vector<1xf32>
    %38 = vector.shape_cast %37 : vector<1xf32> to vector<1x1x1xf32>
    %39 = vector.extract %38[0, 0, 0] : f32 from vector<1x1x1xf32>
    %40 = tpu.iota {dimensions = array<i32: 1>} : vector<1x128xi32>
    %c0_i32 = arith.constant 0 : i32
    %41 = vector.broadcast %c0_i32 : i32 to vector<1x128xi32>
    %42 = arith.cmpi eq, %40, %41 : vector<1x128xi32>
    %43 = vector.broadcast %32 : f32 to vector<1x128xf32>
    %44 = vector.broadcast %39 : f32 to vector<1x128xf32>
    %45 = arith.select %42, %43, %44 : vector<1x128xi1>, vector<1x128xf32>
    %c0_14 = arith.constant 0 : index
    %c0_15 = arith.constant 0 : index
    %46 = vector.load %arg2[%c0_14, %c0_15] : memref<1x128xf32, #tpu.memory_space<vmem>>, vector<1x128xf32>
    tpu.vector_store %arg2[%c0_14, %c0_15], %45 {strides = array<i32>} : memref<1x128xf32, #tpu.memory_space<vmem>>, vector<1x128xf32>,
    return
  }
}

</mosaic_0001>

<bundles_post_ra>
// kernel: tpu_custom_call.1
= control target key start
LH: loop header
LB: loop body
LE: loop exit
PB: predicated region body
PF: predicated region fallthrough
CT: control target
= control target key end

     0   :  { %7 = vsyncpa [#allocation3], 0  ;;  %s334_s0 = inlined_call_operand.hbm [shape: f32[4,256], index: 0, kind: input, shape index: {}]   ;;  %s335_s1 = inlined_call_operand.hbm [shape: f32[8,256], index: 1, kind: input, shape index: {}]   ;;  %s336_s2 = inlined_call_operand.hbm [shape: f32[1,128], index: 2, kind: output, shape index: {}]  }
   0x1   :  { %8 = vsyncpa [#allocation6], 0 }
   0x2   :  { %9 = vsyncpa [#allocation4], 0  ;;  %s260_s9 = smov [#allocation2]   ;;  %s261_s11 = smov [#allocation5]  }
   0x3   :  { %s16_s10 = sshll.u32 %s260_s9, 4  ;;  %s26_s12 = sshll.u32 %s261_s11, 4  ;;  %s17_s10 = int_to_ptr.vmem [resolvable:$true] %s16_s10  ;;  %s27_s12 = int_to_ptr.vmem [resolvable:$true] %s26_s12 }
   0x4   :  { %s188_s15 = scalar_lea.hbm %s334_s0, 128 }
   0x5   :  { %p189_p0 = scmp.ne.s32.totalorder %s334_s0, %s188_s15  ;;  %p192_p1 = scmp.lt.u32.totalorder %s188_s15, %s334_s0 }
   0x7   :  { %p194_p2 = pnand %p192_p1, %p189_p0 }
   0x9   :  { %197 = shalt.err (!%p194_p2)
}
   0xa   :  { %s198_s20 = scalar_lea.vmem %s17_s10, 128  ;;  %p203_p4 = scmp.lt.s32.totalorder %s17_s10, %s17_s10 }
   0xb   :  { %p199_p3 = scmp.ne.s32.totalorder %s17_s10, %s198_s20  ;;  %p204_p5 = scmp.lt.s32.totalorder %s198_s20, %s198_s20 }
   0xd   :  { %p205_p6 = por %p204_p5, %p203_p4 }
   0xf   :  { %p206_p7 = pnand %p205_p6, %p199_p3 }
  0x11   :  { %209 = shalt.err (!%p206_p7)
}
  0x12   :  { %19 = dma.hbm_to_vmem [thread:$0]  %s334_s0, 128, %s17_s10, [#allocation3]  }
  0x13   :  { %s210_s25 = scalar_lea.hbm %s335_s1, 256 }
  0x14   :  { %p211_p8 = scmp.ne.s32.totalorder %s335_s1, %s210_s25  ;;  %p214_p9 = scmp.lt.u32.totalorder %s210_s25, %s335_s1 }
  0x16   :  { %p216_p10 = pnand %p214_p9, %p211_p8 }
  0x18   :  { %219 = shalt.err (!%p216_p10)
}
  0x19   :  { %s220_s30 = scalar_lea.vmem %s27_s12, 256  ;;  %p225_p12 = scmp.lt.s32.totalorder %s27_s12, %s27_s12 }
  0x1a   :  { %p221_p11 = scmp.ne.s32.totalorder %s27_s12, %s220_s30  ;;  %p226_p13 = scmp.lt.s32.totalorder %s220_s30, %s220_s30 }
  0x1c   :  { %p227_p0 = por %p226_p13, %p225_p12 }
  0x1e   :  { %p228_p1 = pnand %p227_p0, %p221_p11 }
  0x20   :  { %231 = shalt.err (!%p228_p1)
}
  0x21   :  { %29 = dma.hbm_to_vmem [thread:$0]  %s335_s1, 256, %s27_s12, [#allocation6]  }
  0x22   :  { %254 = dma.done.wait [#allocation3], 128  }
  0x23   :  { %255 = vsyncadd [#allocation3], 4294967168 }
  0x24   :  { %256 = dma.done.wait [#allocation6], 256  }
  0x25   :  { %257 = vsyncadd [#allocation6], 4294967040  ;;  %v53_v0 = vlaneseq  ;;  %s262_s4 = smov 1   ;;  %v36_v5 = vld [vmem:[#allocation2] sm:$0x33]  ;;  %vm108_vm0 = vcmask 1041408  }
  0x26   :  { %49 = vrot.lane.b32.xlu0 %v36_v5, %s262_s4  ;;  %v47_v6 = vcombine.high %v36_v5, %v36_v5  ;;  %v183_v7 = vld [vmem:[#allocation5 + $0x4] ss:$8 sps:$4 sm:$0xcc]   ;;  %v37_v8 = vld [vmem:[#allocation2] sm:$0xcc]  ;;  %v94_v38 = vrot.slane %v36_v5, 6 }
  0x27   :  { %v303_v1 = vand.u32 127, %v53_v0  ;;  %v125_v9 = vsub.f32 %v37_v8, %v183_v7  ;;  %v42_v14 = vld [vmem:[#allocation5] sm:$0x30]  ;;  %v43_v15 = vld [vmem:[#allocation5 + $0x8] sm:$0x30]  ;;  %s263_s1 = smov [#allocation7]  }
  0x28   :  { %v40_v39 = vld [vmem:[#allocation5] sm:$0xc]  ;;  %v95_v40 = vrot.slane %v47_v6, 6  ;;  %v41_v43 = vld [vmem:[#allocation5 + $0x8] sm:$0xc]  ;;  %s164_s5 = sshll.u32 %s263_s1, 4  ;;  %s165_s5 = int_to_ptr.vmem [resolvable:$true] %s164_s5 }
  0x29   :  { %v63_v2 = vcvt.s32.f32 %v303_v1  ;;  %v58_v3 = vadd.s32 128, %v303_v1  ;;  %v126_v10 = vmul.f32 %v125_v9, %v125_v9  ;;  %vm55_vm1 = vcmp.lt.s32.totalorder %v303_v1, 1  ;;  %v38_v49 = vld [vmem:[#allocation5] sm:$0x3]  ;;  %v39_v52 = vld [vmem:[#allocation5 + $0x8] sm:$0x3]  ;;  %p237_p3 = scmp.lt.s32.totalorder %s165_s5, %s165_s5 }
  0x2a   :  { %51 = vrot.lane.b32.xlu0 %v47_v6, %s262_s4  ;;  %v59_v35 = vxor.u32 1, %v303_v1  ;;  %v98_v45 = vmul.f32 %v94_v38, %v40_v39  ;;  %v99_v51 = vmul.f32 %v95_v40, %v41_v43  ;;  %vm153_vm4 = vcmp.eq.s32.totalorder %v303_v1, 0  ;;  %s232_s8 = scalar_lea.vmem %s165_s5, 16  ;;  %s236_s9 = scalar_lea.vmem %s165_s5, 32 }
  0x2b   :  { %65 = vrot.lane.b32.xlu1 %v63_v2, %s262_s4  ;;  %v64_v4 = vcvt.s32.f32 %v58_v3  ;;  %v128_v11 = vcombine.high %v126_v10, %v126_v10  ;;  %v129_v12 = vrot.slane %v126_v10, 6  ;;  %v60_v36 = vxor.u32 1, %v58_v3  ;;  %p233_p2 = scmp.ne.s32.totalorder %s165_s5, %s232_s8  ;;  %p238_p4 = scmp.lt.s32.totalorder %s236_s9, %s232_s8 }
  0x2c   :  { %v61_v41 = vcvt.s32.f32 %v59_v35  ;;  %v102_v54 = vrot.slane %v98_v45, 2  ;;  %v103_v58 = vrot.slane %v99_v51, 2 }
  0x2d   :  { %v130_v13 = vrot.slane %v128_v11, 6  ;;  %v133_v16 = vmul.f32 %v129_v12, %v42_v14  ;;  %v62_v44 = vcvt.s32.f32 %v60_v36  ;;  %p239_p5 = por %p238_p4, %p237_p3 }
  0x2f   :  { %67 = vrot.lane.b32.xlu1 %v64_v4, %s262_s4  ;;  %v134_v17 = vmul.f32 %v130_v13, %v43_v15  ;;  %v137_v18 = vrot.slane %v133_v16, 4  ;;  %p240_p6 = pnand %p239_p5, %p233_p2 }
  0x31   :  { %v138_v19 = vrot.slane %v134_v17, 4  ;;  %v141_v20 = vsel %vm108_vm0, %v137_v18, 0.0 }
  0x33   :  { %v142_v21 = vsel %vm108_vm0, %v138_v19, 0.0 }
  0x34   :  { %v143_v22 = vadd.f32 %v142_v21, %v141_v20 }
  0x53   :  { %144 = vadd.xlane.f32.xlu1 %v143_v22 }
  0x98   :  { %v50_v23 = vpop.permute.xlu0 %49 }
  0x9c   :  { %v52_v24 = vpop.permute.xlu0 %51 }
  0x9d   :  { %v56_v25 = vsel %vm55_vm1, %v50_v23, %v52_v24  ;;  %v57_v26 = vsel %vm55_vm1, %v52_v24, %v50_v23  ;;  %v66_v34 = vpop.permute.xlu1 %65 }
  0x9e   :  { %v75_v27 = vcombine.low %v57_v26, %v56_v25 }
  0xa0   :  { %v78_v28 = vsub.f32 %v36_v5, %v75_v27  ;;  %v77_v48 = vmax.f32 %v36_v5, %v75_v27 }
  0xa1   :  { %v68_v37 = vpop.permute.xlu1 %67 }
  0xa2   :  { %v79_v29 = vand.u32 2147483647, %v78_v28  ;;  %v70_v42 = vsel %vm55_vm1, %v68_v37, %v66_v34  ;;  %v69_v47 = vsel %vm55_vm1, %v66_v34, %v68_v37 }
  0xa3   :  { %vm71_vm2 = vcmp.eq.f32.partialorder %v70_v42, %v61_v41  ;;  %vm72_vm3 = vcmp.eq.f32.partialorder %v69_v47, %v62_v44 }
  0xa4   :  { %v80_v30 = vsub.f32 0.0, %v79_v29  ;;  %v87_v55 = vsel %vm71_vm2, %v38_v49, 0.0  ;;  %v88_v59 = vsel %vm72_vm3, %v39_v52, 0.0 }
  0xa6   :  { %v81_v31 = vmul.f32 1.442695, %v80_v30 }
  0xa8   :  { %184 = vpow2.f32 %v81_v31 }
  0xb2   :  { %v185_v32 = vpop.eup %184 }
  0xb3   :  { %v83_v33 = vadd.f32 1.0, %v185_v32 }
  0xb5   :  { %186 = vlog2.f32 %v83_v33 }
  0xbf   :  { %v187_v46 = vpop.eup %186 }
  0xc0   :  { %v85_v50 = vmul.f32 0.6931472, %v187_v46 }
  0xc2   :  { %v86_v53 = vadd.f32 %v85_v50, %v77_v48 }
  0xc4   :  { %v90_v56 = vcombine.high %v86_v53, %v86_v53  ;;  %v92_v57 = vmul.f32 %v87_v55, %v86_v53 }
  0xc6   :  { %v93_v60 = vmul.f32 %v90_v56, %v88_v59  ;;  %v106_v61 = vsub.f32 %v92_v57, %v102_v54 }
  0xc8   :  { %v107_v62 = vsub.f32 %v93_v60, %v103_v58  ;;  %v109_v63 = vsel %vm108_vm0, %v106_v61, 0.0 }
  0xca   :  { %v110_v0 = vsel %vm108_vm0, %v107_v62, 0.0 }
  0xcb   :  { %v111_v2 = vadd.f32 %v110_v0, %v109_v63 }
  0xcd   :  { %112 = vadd.xlane.f32.xlu0 %v111_v2 }
  0xe0   :  { %v145_v3 = vpop.xlane.xlu1 %144 }
  0xe1   :  { %v146_v4 = vrot.slane %v145_v3, 4 }
  0xe3   :  { %v147_v5 = vadd.f32 %v146_v4, %v145_v3 }
  0xe5   :  { %v148_v6 = vrot.slane %v147_v5, 2 }
  0xe7   :  { %v149_v10 = vadd.f32 %v148_v6, %v147_v5 }
  0xe9   :  { %v150_v13 = vrot.slane %v149_v10, 1 }
  0xeb   :  { %v151_v16 = vadd.f32 %v150_v13, %v149_v10 }
 0x15a   :  { %v113_v7 = vpop.xlane.xlu0 %112 }
 0x15b   :  { %v114_v8 = vrot.slane %v113_v7, 4 }
 0x15d   :  { %v115_v9 = vadd.f32 %v114_v8, %v113_v7 }
 0x15f   :  { %v116_v11 = vrot.slane %v115_v9, 2 }
 0x161   :  { %v117_v12 = vadd.f32 %v116_v11, %v115_v9 }
 0x163   :  { %v118_v14 = vrot.slane %v117_v12, 1 }
 0x165   :  { %v119_v15 = vadd.f32 %v118_v14, %v117_v12 }
 0x167   :  { %174 = vpush %v119_v15 }
 0x168   :  { %176 = vpush %v151_v16 }
 0x198   :  { %s175_s6 = spop %174 }
 0x199   :  { %v154_v17 = vstv %s175_s6  ;;  %s177_s7 = spop %176 }
 0x19a   :  { %v155_v18 = vstv %s177_s7 }
 0x19b   :  { %v156_v19 = vsel %vm153_vm4, %v154_v17, %v155_v18 }
 0x19c   :  { %157 = vst [vmem:[#allocation7] sm:$0x1] %v156_v19 }
 0x19d   :  { %243 = shalt.err (!%p240_p6)
}
 0x19e   :  { %s244_s12 = scalar_lea.hbm %s336_s2, 16 }
 0x19f   :  { %p245_p7 = scmp.ne.s32.totalorder %s336_s2, %s244_s12  ;;  %p248_p8 = scmp.lt.u32.totalorder %s244_s12, %s336_s2 }
 0x1a1   :  { %p250_p9 = pnand %p248_p8, %p245_p7 }
 0x1a3   :  { %253 = shalt.err (!%p250_p9)
}
 0x1a4   :  { %167 = dma.vmem_to_hbm [thread:$0]  %s165_s5, 16, %s336_s2, [#allocation4]  }
 0x1a5   :  { %258 = dma.done.wait [#allocation4], 16  }
 0x1a6   :  { %259 = vsyncadd [#allocation4], 4294967280 }
 0x1a7   :  { %171 = vsyncpa [#allocation3], 1 }
 0x1a8   :  { %172 = vsyncpa [#allocation6], 1 }
 0x1a9   :  { %173 = vsyncpa [#allocation4], 1 }

</bundles_post_ra>
